<compile_context>
chip_gen: v7x
topology: tpu7x:2x2x1
jax: 0.10.0
libtpu: 0.0.40
codegen_flags: <defaults>
</compile_context>

<pallas_src>
import jax
import jax.numpy as jnp
from jax.experimental import pallas as pl
from jax.experimental.pallas import tpu as pltpu


def _round_up(a, m):
    return (a + m - 1) // m * m


def arcface_cosine_kernel(x_ref, y_ref, w_ref, o_ref, acc_ref):
    """One (batch_tile, k_tile) grid step.

    x_ref:   (tm, tk)      bf16   flattened image x, K-slice
    y_ref:   (tm, tk)      bf16   flattened image y, K-slice
    w_ref:   (tk, E)       bf16   feature projection K-slice ("facenet" stand-in)
    o_ref:   (tm, 128)     f32    cosine per row, replicated across lanes
    acc_ref: (2*tm, E)     f32    stacked [x_feats; y_feats] accumulator
    """
    k = pl.program_id(1)
    tm = x_ref.shape[0]

    @pl.when(k == 0)
    def _init():
        acc_ref[...] = jnp.zeros_like(acc_ref)

    # Single MXU pass: stack x and y rows (M = 2*tm) so the weight K-tile is
    # pushed through the systolic array once per step instead of twice.
    xy = jnp.concatenate([x_ref[...], y_ref[...]], axis=0)          # (2*tm, tk) bf16
    acc_ref[...] += jnp.dot(xy, w_ref[...],
                            preferred_element_type=jnp.float32)     # (2*tm, E) f32

    @pl.when(k == pl.num_programs(1) - 1)
    def _finalize():
        xf = acc_ref[0:tm, :]           # (tm, E) f32
        yf = acc_ref[tm:2 * tm, :]      # (tm, E) f32

        dot = jnp.sum(xf * yf, axis=-1, keepdims=True)   # (tm, 1)
        xx = jnp.sum(xf * xf, axis=-1, keepdims=True)
        yy = jnp.sum(yf * yf, axis=-1, keepdims=True)

        # torch F.cosine_similarity: cos = dot / (max(||x||,eps) * max(||y||,eps))
        #   max(sqrt(xx), eps) * max(sqrt(yy), eps)
        # == sqrt(max(xx, eps^2) * max(yy, eps^2)); rsqrt runs on the EUP.
        eps2 = jnp.float32(1e-8) * jnp.float32(1e-8)
        cos = dot * jax.lax.rsqrt(jnp.maximum(xx, eps2) * jnp.maximum(yy, eps2))

        # Lane-dense store: replicate the per-row scalar across the 128 lanes
        # so the output writeback is a full-width unmasked vector store.
        o_ref[...] = jnp.broadcast_to(cos, o_ref.shape)


def arcface_loss_forward(x_nchw, y_nchw, w, *, tm=128, tk=None):
    """x_nchw, y_nchw: [B, C, H, W] float images in [-1, 1].
    w: [C*H*W, E] feature-projection weight (facenet stand-in).
    Returns: [B] cosine similarities (float32)."""
    B = x_nchw.shape[0]
    D = x_nchw.shape[1] * x_nchw.shape[2] * x_nchw.shape[3]
    E = w.shape[1]
    assert w.shape[0] == D

    if tk is None:
        # Big K tiles at real ArcFace sizes (D ~ 37k); smaller for tiny demos
        # so the reduction loop is actually exercised.
        tk = 2048 if D >= 2048 else 256

    B_pad = _round_up(B, tm)
    D_pad = _round_up(D, tk)
    E_pad = _round_up(E, 128)

    def _pad2(a, rows, cols, dtype):
        a = a.astype(dtype)
        pr, pc = rows - a.shape[0], cols - a.shape[1]
        if pr or pc:
            a = jnp.pad(a, ((0, pr), (0, pc)))
        return a

    # bf16 matmul operands (MXU fast path, half the HBM->VMEM bytes);
    # accumulation and the cosine epilogue stay in f32 inside the kernel.
    x_flat = _pad2(x_nchw.reshape(B, D), B_pad, D_pad, jnp.bfloat16)
    y_flat = _pad2(y_nchw.reshape(B, D), B_pad, D_pad, jnp.bfloat16)
    w_pad = _pad2(w, D_pad, E_pad, jnp.bfloat16)

    nb = B_pad // tm
    nk = D_pad // tk

    grid_spec = pltpu.PrefetchScalarGridSpec(
        num_scalar_prefetch=0,
        grid=(nb, nk),  # batch tiles outer ("parallel"), reduction innermost
        in_specs=[
            pl.BlockSpec((tm, tk), lambda b, k: (b, k)),       # x
            pl.BlockSpec((tm, tk), lambda b, k: (b, k)),       # y
            pl.BlockSpec((tk, E_pad), lambda b, k: (k, 0)),    # w (ignores b)
        ],
        out_specs=pl.BlockSpec((tm, 128), lambda b, k: (b, 0)),
        scratch_shapes=[pltpu.VMEM((2 * tm, E_pad), jnp.float32)],
    )

    out = pl.pallas_call(
        arcface_cosine_kernel,
        out_shape=jax.ShapeDtypeStruct((B_pad, 128), jnp.float32),
        grid_spec=grid_spec,
        compiler_params=pltpu.CompilerParams(
            # batch axis parallel (v7x 2 TCs), reduction axis arbitrary.
            dimension_semantics=("parallel", "arbitrary"),
            # Explicit budget that fits v7x's 64 MiB VMEM per TensorCore.
            vmem_limit_bytes=48 * 1024 * 1024,
        ),
    )(x_flat, y_flat, w_pad)

    # Column 0 holds the cosine (replicated across lanes); drop batch padding.
    return out[:B, 0]


if __name__ == "__main__":
    # Small, deterministic example shapes.
    B, C, H, W = 2, 3, 16, 16          # images (NCHW)
    D = C * H * W                      # 768 (multiple of 128)
    E = 128                            # embedding dim (stand-in for 512)

    key = jax.random.PRNGKey(0)
    kx, ky, kw = jax.random.split(key, 3)

    # Images in [-1, 1] like the PyTorch module expects.
    x = jax.random.uniform(kx, (B, C, H, W), jnp.float32, minval=-1.0, maxval=1.0)
    y = jax.random.uniform(ky, (B, C, H, W), jnp.float32, minval=-1.0, maxval=1.0)

    # Deterministic "facenet" projection weight.
    w = (jax.random.normal(kw, (D, E), jnp.float32) / jnp.sqrt(D)).astype(jnp.float32)

    # tk=256 so the K-reduction loop (nk=3) and accumulator phases are exercised.
    cos_sim = arcface_loss_forward(x, y, w, tm=128, tk=256)
    jax.block_until_ready(cos_sim)

    # Reference in plain JAX with the same bf16 rounding of matmul inputs.
    xb = x.reshape(B, D).astype(jnp.bfloat16)
    yb = y.reshape(B, D).astype(jnp.bfloat16)
    wb = w.astype(jnp.bfloat16)
    xf = jnp.dot(xb, wb, preferred_element_type=jnp.float32)
    yf = jnp.dot(yb, wb, preferred_element_type=jnp.float32)
    eps = 1e-8
    ref = jnp.sum(xf * yf, -1) / (
        jnp.maximum(jnp.linalg.norm(xf, axis=-1), eps)
        * jnp.maximum(jnp.linalg.norm(yf, axis=-1), eps)
    )

    assert cos_sim.shape == (B,)
    assert jnp.allclose(cos_sim, ref, atol=1e-3, rtol=1e-3), (cos_sim, ref)

    print("KERNEL_OK")
</pallas_src>

<mosaic_0001>
module attributes {stable_mosaic.version = 11 : i64} {
  func.func @arcface_cosine_kernel(%arg0: i32, %arg1: i32, %arg2: memref<128x256xbf16, #tpu.memory_space<vmem>>, %arg3: memref<128x256xbf16, #tpu.memory_space<vmem>>, %arg4: memref<256x128xbf16, #tpu.memory_space<vmem>>, %arg5: memref<128x128xf32, #tpu.memory_space<vmem>>, %arg6: memref<256x128xf32, #tpu.memory_space<vmem>>) attributes {dimension_semantics = [#tpu.dimension_semantics<parallel>, #tpu.dimension_semantics<arbitrary>], iteration_bounds = array<i64: 1, 3>, scalar_prefetch = 0 : i64, scratch_operands = 1 : i64, tpu.core_type = #tpu.core_type<tc>, window_params = [{transform_indices = @transform_0, window_bounds = array<i64: 128, 256>}, {transform_indices = @transform_1, window_bounds = array<i64: 128, 256>}, {transform_indices = @transform_2, window_bounds = array<i64: 256, 128>}, {transform_indices = @transform_3, window_bounds = array<i64: 128, 128>}]} {
    %c0_i32 = arith.constant 0 : i32
    %0 = arith.cmpi eq, %arg1, %c0_i32 : i32
    %1 = arith.extui %0 : i1 to i32
    %c0_i32_0 = arith.constant 0 : i32
    %2 = arith.cmpi ne, %1, %c0_i32_0 : i32
    scf.if %2 {
      %cst_11 = arith.constant 0.000000e+00 : f32
      %14 = vector.broadcast %cst_11 : f32 to vector<256x128xf32>
      %c0_12 = arith.constant 0 : index
      %c0_13 = arith.constant 0 : index
      %15 = vector.load %arg6[%c0_12, %c0_13] : memref<256x128xf32, #tpu.memory_space<vmem>>, vector<256x128xf32>
      tpu.vector_store %arg6[%c0_12, %c0_13], %14 {strides = array<i32>} : memref<256x128xf32, #tpu.memory_space<vmem>>, vector<256x128xf32>,
    } else {
    }
    %c0 = arith.constant 0 : index
    %c0_1 = arith.constant 0 : index
    %3 = vector.load %arg2[%c0, %c0_1] : memref<128x256xbf16, #tpu.memory_space<vmem>>, vector<128x256xbf16>
    %c0_2 = arith.constant 0 : index
    %c0_3 = arith.constant 0 : index
    %4 = vector.load %arg3[%c0_2, %c0_3] : memref<128x256xbf16, #tpu.memory_space<vmem>>, vector<128x256xbf16>
    %5 = tpu.concatenate %3, %4 in 0 : vector<128x256xbf16>, vector<128x256xbf16> -> vector<256x256xbf16>
    %c0_4 = arith.constant 0 : index
    %c0_5 = arith.constant 0 : index
    %6 = vector.load %arg6[%c0_4, %c0_5] : memref<256x128xf32, #tpu.memory_space<vmem>>, vector<256x128xf32>
    %c0_6 = arith.constant 0 : index
    %c0_7 = arith.constant 0 : index
    %7 = vector.load %arg4[%c0_6, %c0_7] : memref<256x128xbf16, #tpu.memory_space<vmem>>, vector<256x128xbf16>
    %cst = arith.constant dense<0.000000e+00> : vector<256x128xf32>
    %8 = tpu.matmul %5, %7, %cst {dimension_numbers = #tpu.dot_dimension_numbers<[1], [0], [0], [1], [0, 0, 1, 1], [], []>} : vector<256x256xbf16>, vector<256x128xbf16>, vector<256x128xf32> -> vector<256x128xf32>
    %9 = arith.addf %6, %8 : vector<256x128xf32>
    %c0_8 = arith.constant 0 : index
    %c0_9 = arith.constant 0 : index
    %10 = vector.load %arg6[%c0_8, %c0_9] : memref<256x128xf32, #tpu.memory_space<vmem>>, vector<256x128xf32>
    tpu.vector_store %arg6[%c0_8, %c0_9], %9 {strides = array<i32>} : memref<256x128xf32, #tpu.memory_space<vmem>>, vector<256x128xf32>,
    %c2_i32 = arith.constant 2 : i32
    %11 = arith.cmpi eq, %arg1, %c2_i32 : i32
    %12 = arith.extui %11 : i1 to i32
    %c0_i32_10 = arith.constant 0 : i32
    %13 = arith.cmpi ne, %12, %c0_i32_10 : i32
    scf.if %13 {
      %c0_11 = arith.constant 0 : index
      %c0_12 = arith.constant 0 : index
      %14 = vector.load %arg6[%c0_11, %c0_12] : memref<256x128xf32, #tpu.memory_space<vmem>>, vector<128x128xf32>
      %c128 = arith.constant 128 : index
      %c0_13 = arith.constant 0 : index
      %15 = vector.load %arg6[%c128, %c0_13] : memref<256x128xf32, #tpu.memory_space<vmem>>, vector<128x128xf32>
      %16 = arith.mulf %14, %15 : vector<128x128xf32>
      %cst_14 = arith.constant dense<0.000000e+00> : vector<128xf32>
      %17 = vector.multi_reduction <add>, %16, %cst_14 [1] : vector<128x128xf32> to vector<128xf32>
      %18 = vector.shape_cast %17 : vector<128xf32> to vector<128x1xf32>
      %19 = arith.mulf %14, %14 : vector<128x128xf32>
      %cst_15 = arith.constant dense<0.000000e+00> : vector<128xf32>
      %20 = vector.multi_reduction <add>, %19, %cst_15 [1] : vector<128x128xf32> to vector<128xf32>
      %21 = vector.shape_cast %20 : vector<128xf32> to vector<128x1xf32>
      %22 = arith.mulf %15, %15 : vector<128x128xf32>
      %cst_16 = arith.constant dense<0.000000e+00> : vector<128xf32>
      %23 = vector.multi_reduction <add>, %22, %cst_16 [1] : vector<128x128xf32> to vector<128xf32>
      %24 = vector.shape_cast %23 : vector<128xf32> to vector<128x1xf32>
      %cst_17 = arith.constant 9.99999993E-9 : f32
      %cst_18 = arith.constant 9.99999993E-9 : f32
      %25 = arith.mulf %cst_17, %cst_18 : f32
      %26 = vector.broadcast %25 : f32 to vector<128x1xf32>
      %27 = arith.maximumf %21, %26 : vector<128x1xf32>
      %28 = vector.broadcast %25 : f32 to vector<128x1xf32>
      %29 = arith.maximumf %24, %28 : vector<128x1xf32>
      %30 = arith.mulf %27, %29 : vector<128x1xf32>
      %31 = math.rsqrt %30 : vector<128x1xf32>
      %32 = arith.mulf %18, %31 : vector<128x1xf32>
      %33 = vector.shape_cast %32 : vector<128x1xf32> to vector<128x1xf32>
      %34 = vector.broadcast %33 : vector<128x1xf32> to vector<128x128xf32>
      %c0_19 = arith.constant 0 : index
      %c0_20 = arith.constant 0 : index
      %35 = vector.load %arg5[%c0_19, %c0_20] : memref<128x128xf32, #tpu.memory_space<vmem>>, vector<128x128xf32>
      tpu.vector_store %arg5[%c0_19, %c0_20], %34 {strides = array<i32>} : memref<128x128xf32, #tpu.memory_space<vmem>>, vector<128x128xf32>,
    } else {
    }
    return
  }
  func.func @transform_0(%arg0: i32, %arg1: i32) -> (i32, i32) {
    %c0_i32 = arith.constant 0 : i32
    return %arg0, %arg1 : i32, i32
  }
  func.func @transform_1(%arg0: i32, %arg1: i32) -> (i32, i32) {
    %c0_i32 = arith.constant 0 : i32
    return %arg0, %arg1 : i32, i32
  }
  func.func @transform_2(%arg0: i32, %arg1: i32) -> (i32, i32) {
    %c0_i32 = arith.constant 0 : i32
    %c0_i32_0 = arith.constant 0 : i32
    return %arg1, %c0_i32 : i32, i32
  }
  func.func @transform_3(%arg0: i32, %arg1: i32) -> (i32, i32) {
    %c0_i32 = arith.constant 0 : i32
    %c0_i32_0 = arith.constant 0 : i32
    return %arg0, %c0_i32 : i32, i32
  }
}

</mosaic_0001>

<bundles_post_ra>
// kernel: tpu_custom_call.1
= control target key start
LH: loop header
LB: loop body
LE: loop exit
PB: predicated region body
PF: predicated region fallthrough
CT: control target
= control target key end

     0   :  { %8 = vsyncpa [#allocation4], 0  ;;  %s2274_s0 = inlined_call_operand.hbm [shape: bf16[128,768], index: 0, kind: input, shape index: {}]   ;;  %s2275_s1 = inlined_call_operand.hbm [shape: bf16[128,768], index: 1, kind: input, shape index: {}]   ;;  %s2276_s2 = inlined_call_operand.hbm [shape: bf16[768,128], index: 2, kind: input, shape index: {}]   ;;  %s2277_s3 = inlined_call_operand.hbm [shape: f32[128,128], index: 3, kind: output, shape index: {}]  }
   0x1   :  { %10 = vsyncpa [#allocation4 + $0x1], 0 }
   0x2   :  { %11 = vsyncpa [#allocation7], 0 }
   0x3   :  { %13 = vsyncpa [#allocation7 + $0x1], 0 }
   0x4   :  { %14 = vsyncpa [#allocation5], 0  ;;  %s1884_s12 = smov 0   ;;  %s1886_s13 = smov 0  }
   0x5   :  { %s1888_s14 = smov 0   ;;  %s1890_s15 = smov 0  }
   0x6   :  { %s1892_s16 = smov 0   ;;  %s1894_s17 = smov 0  }
   0x7 LB: > { %s1913_s18 = sadd.s32 4294967295, %s1850_s17   ;;  %s29_s19 = sadd.s32 1, %s1846_s16  ;;  %s1850_s17 = sphi %s1894_s17, %s20_s17   ;;  %s1846_s16 = sphi %s1892_s16, %s2295_s16   ;;  %s1842_s15 = sphi %s1890_s15, %s2294_s15   ;;  %s1838_s14 = sphi %s1888_s14, %s2293_s14   ;;  %s1834_s13 = sphi %s1886_s13, %s2292_s13   ;;  %s1830_s12 = sphi %s1884_s12, %s2291_s12  }
   0x8   : > { %p30_p0 = scmp.ge.s32.totalorder %s29_s19, 3  ;;  %s41_s20 = sadd.s32 1, %s1838_s14 }
   0x9   : > { %p48_p1 = scmp.ne.s32.totalorder %s1838_s14, %s1834_s13  ;;  %p49_p2 = scmp.eq.s32.totalorder %s1850_s17, 0 }
   0xa   : > { %s2297_s19 = smov (%p30_p0, %s29_s19), 0  ;;  %p54_p4 = scmp.ne.s32.totalorder %s1834_s13, %s1830_s12 }
   0xb   : > { %p50_p3 = por %p49_p2, %p48_p1  ;;  %s37_s21 = ssub.s32 %s1846_s16, %s2297_s19 }
   0xc   : > { %p55_p5 = scmp.eq.s32.totalorder %s1913_s18, 0  ;;  %p39_p6 = scmp.eq.s32.totalorder %s37_s21, 0 }
   0xd   : > { %p1520_p8 = scmp.lt.s32.totalorder %s1850_s17, 3  ;;  %s158_s24 = sand.u32 1, %s1838_s14  }
   0xe   : > { %p1926_p7 = por %p55_p5, %p54_p4  ;;  %s1369_s25 = sshll.u32 %s1846_s16, 7 }
   0xf   : > { %s1932_s23 = scalar_select %p39_p6, %s1838_s14, %s41_s20  }
  0x10   : > { %s2281_s22 = scalar_select %p1926_p7, 1, 0 }
  0x11   : > { %s1938_s26 = sshll.u32 %s158_s24, 7  ;;  %p1940_p9 = pnand %p1520_p8, %p50_p3 }
  0x12   : > { %s182_s28 = sand.u32 1, %s1850_s17   ;;  %s1950_s4 = scalar_lea.hbm %s2275_s1, %s1369_s25 }
  0x13   : > { %s186_s5 = scalar_lea.vmem [#allocation6], %s1938_s26  ;;  %s1957_s7 = scalar_lea.sflag [#allocation7], %s182_s28 }
  0x14   : > { %s196_s6 = sshll.u32 %s186_s5, 4  ;;  %s1676_s8 = scalar_lea.hbm %s1950_s4, 2048  ;;  %s1954_s6 = int_to_ptr.vmem [resolvable:$true] %s196_s6 }
  0x15   : > { %p1677_p12 = scmp.ne.s32.totalorder %s1950_s4, %s1676_s8  ;;  %p1963_p13 = pneg %p1940_p9 }
  0x16   : > { %s1681_s12 = scalar_lea.hbm %s2275_s1, 6144  ;;  %p1682_p2 = scmp.lt.u32.totalorder %s1950_s4, %s2275_s1 }
  0x17   : > { %p1679_p0 = pnand %p1963_p13, %p1677_p12  ;;  %p1683_p3 = scmp.lt.u32.totalorder %s1681_s12, %s1676_s8 }
  0x18   : > { %p1685_p5 = scmp.lt.u32.totalorder %s1676_s8, %s1950_s4 }
  0x19   : > { %p1680_p1 = pneg %p1679_p0  ;;  %p1684_p4 = por %p1683_p3, %p1682_p2 }
  0x1b   : > { %p1686_p6 = por %p1685_p5, %p1684_p4 }
  0x1d   : > { %p1687_p8 = pnand %p1686_p6, %p1680_p1 }
  0x1f   : > { %1690 = shalt.err (!%p1687_p8)
}
  0x20   : > { %s1691_s28 = scalar_lea.vmem %s1954_s6, 2048  ;;  %s1852_s29 = smov [#allocation6]  }
  0x21   : > { %p1692_p12 = scmp.ne.s32.totalorder %s1954_s6, %s1691_s28  ;;  %s1696_s30 = sshll.u32 %s1852_s29, 4  ;;  %s1697_s30 = int_to_ptr.vmem [resolvable:$false] %s1696_s30 }
  0x22   : > { %s1698_s5 = scalar_lea.vmem %s1697_s30, 4096  ;;  %p1699_p11 = scmp.lt.s32.totalorder %s1954_s6, %s1697_s30 }
  0x23   : > { %p1694_p0 = pnand %p1692_p12, %p1963_p13  ;;  %p1700_p7 = scmp.lt.s32.totalorder %s1698_s5, %s1691_s28 }
  0x25   : > { %p1695_p10 = pneg %p1694_p0  ;;  %p1701_p2 = por %p1700_p7, %p1699_p11 }
  0x27   : > { %p1702_p3 = pnand %p1701_p2, %p1695_p10 }
  0x29   : > { %1705 = shalt.err (!%p1702_p3)
}
  0x2a   : > { %s2279_s8 = smov 384   ;;  %s2280_s10 = smov 128  }
  0x2b   : > { %s1855_s11 = smov 8   ;;  %p2284_p7 = scmp.lt.s32.totalorder %s1850_s17, 4 }
  0x2c   : > { %1516 = dma.hbm_to_vmem [thread:$0]  (!%p1940_p9), %s1950_s4, 2048, %s1954_s6, %s1957_s7, %s2279_s8, %s2280_s10, %s1855_s11  }
  0x2d   : > { %p2285_p10 = scmp.ge.s32.totalorder %s1850_s17, 1  ;;  %s2003_s28 = scalar_lea.hbm %s2274_s0, %s1369_s25 }
  0x2e   : > { %s162_s29 = scalar_lea.vmem [#allocation3], %s1938_s26  ;;  %s1371_s4 = sshll.u32 %s1846_s16, 11 }
  0x2f   : > { %p1994_p11 = pnand %p2285_p10, %p2284_p7  ;;  %s172_s30 = sshll.u32 %s162_s29, 4  ;;  %s2006_s30 = int_to_ptr.vmem [resolvable:$true] %s172_s30 }
  0x30   : > { %s2011_s6 = scalar_lea.sflag [#allocation4], %s158_s24  ;;  %s1706_s5 = scalar_lea.hbm %s2003_s28, 2048 }
  0x31   : > { %s2286_s12 = scalar_select %p1994_p11, 1, 0 }
  0x32   : > { %p1707_p1 = scmp.ne.s32.totalorder %s2003_s28, %s1706_s5  ;;  %s1711_s21 = scalar_lea.hbm %s2274_s0, 6144 }
  0x33   : > { %p1712_p6 = scmp.lt.u32.totalorder %s2003_s28, %s2274_s0  ;;  %p1713_p8 = scmp.lt.u32.totalorder %s1711_s21, %s1706_s5 }
  0x34   : > { %p1709_p4 = pnand %p1707_p1, %p1963_p13  ;;  %p1715_p0 = scmp.lt.u32.totalorder %s1706_s5, %s2003_s28 }
  0x35   : > { %p1714_p12 = por %p1713_p8, %p1712_p6 }
  0x36   : > { %p1710_p5 = pneg %p1709_p4 }
  0x37   : > { %p1716_p2 = por %p1715_p0, %p1714_p12 }
  0x39   : > { %p1717_p3 = pnand %p1716_p2, %p1710_p5 }
  0x3b   : > { %1720 = shalt.err (!%p1717_p3)
}
  0x3c   : > { %s1721_s24 = scalar_lea.vmem %s2006_s30, 2048  ;;  %s1856_s29 = smov [#allocation3]  }
  0x3d   : > { %p1722_p7 = scmp.ne.s32.totalorder %s2006_s30, %s1721_s24  ;;  %s1726_s20 = sshll.u32 %s1856_s29, 4  ;;  %s1727_s20 = int_to_ptr.vmem [resolvable:$false] %s1726_s20 }
  0x3e   : > { %s1728_s8 = scalar_lea.vmem %s1727_s20, 4096  ;;  %p1729_p4 = scmp.lt.s32.totalorder %s2006_s30, %s1727_s20 }
  0x3f   : > { %p1724_p10 = pnand %p1722_p7, %p1963_p13  ;;  %p1730_p11 = scmp.lt.s32.totalorder %s1728_s8, %s1721_s24 }
  0x41   : > { %p1725_p1 = pneg %p1724_p10  ;;  %p1731_p6 = por %p1730_p11, %p1729_p4 }
  0x43   : > { %p1732_p8 = pnand %p1731_p6, %p1725_p1 }
  0x45   : > { %1735 = shalt.err (!%p1732_p8)
}
  0x46   : > { %s2287_s10 = smov 128   ;;  %s2288_s5 = smov 384  }
  0x47   : > { %1513 = dma.hbm_to_vmem [thread:$0]  (!%p1940_p9), %s2003_s28, 2048, %s2006_s30, %s2011_s6, %s2288_s5, %s2287_s10, %s1855_s11  }
  0x48   : > { %s2043_s24 = scalar_lea.hbm %s2276_s2, %s1371_s4  ;;  %s210_s29 = scalar_lea.vmem [#allocation8], %s1938_s26 }
  0x49   : > { %s217_s20 = sshll.u32 %s210_s29, 4  ;;  %s1736_s8 = scalar_lea.hbm %s2043_s24, 2048  ;;  %s2046_s20 = int_to_ptr.vmem [resolvable:$true] %s217_s20 }
  0x4a   : > { %p1737_p11 = scmp.ne.s32.totalorder %s2043_s24, %s1736_s8  ;;  %s1741_s30 = scalar_lea.hbm %s2276_s2, 6144 }
  0x4b   : > { %p1742_p0 = scmp.lt.u32.totalorder %s2043_s24, %s2276_s2  ;;  %p1743_p2 = scmp.lt.u32.totalorder %s1741_s30, %s1736_s8 }
  0x4c   : > { %p1739_p5 = pnand %p1737_p11, %p1963_p13  ;;  %p1745_p7 = scmp.lt.u32.totalorder %s1736_s8, %s2043_s24 }
  0x4d   : > { %p1744_p3 = por %p1743_p2, %p1742_p0 }
  0x4e   : > { %p1740_p12 = pneg %p1739_p5 }
  0x4f   : > { %p1746_p10 = por %p1745_p7, %p1744_p3 }
  0x51   : > { %p1747_p1 = pnand %p1746_p10, %p1740_p12 }
  0x53   : > { %1750 = shalt.err (!%p1747_p1)
}
  0x54   : > { %s1751_s26 = scalar_lea.vmem %s2046_s20, 2048  ;;  %s1857_s10 = smov [#allocation8]  }
  0x55   : > { %p1752_p4 = scmp.ne.s32.totalorder %s2046_s20, %s1751_s26  ;;  %s1756_s5 = sshll.u32 %s1857_s10, 4  ;;  %s1757_s5 = int_to_ptr.vmem [resolvable:$false] %s1756_s5 }
  0x56   : > { %s1758_s25 = scalar_lea.vmem %s1757_s5, 4096  ;;  %p1759_p11 = scmp.lt.s32.totalorder %s2046_s20, %s1757_s5 }
  0x57   : > { %p1754_p6 = pnand %p1752_p4, %p1963_p13  ;;  %p1760_p5 = scmp.lt.s32.totalorder %s1758_s25, %s1751_s26 }
  0x59   : > { %p1755_p8 = pneg %p1754_p6  ;;  %p1761_p0 = por %p1760_p5, %p1759_p11 }
  0x5b   : > { %p1762_p2 = pnand %p1761_p0, %p1755_p8 }
  0x5d   : > { %1765 = shalt.err (!%p1762_p2)
}
  0x5e   : > { %s1858_s21 = smov 64   ;;  %s1859_s29 = smov 4  }
  0x5f   : > { %1519 = dma.hbm_to_vmem [thread:$0]  (!%p1940_p9), %s2043_s24, 2048, %s2046_s20, %s1957_s7, %s1858_s21, %s1858_s21, %s1859_s29  }
  0x60   : > { %p2289_p13 = scmp.ne.s32.totalorder %s2286_s12, 0 }
  0x61   : > { %s231_s9 = sand.u32 (!%p2289_p13), 1, %s1834_s13   ;;  %p2290_p12 = scmp.ne.s32.totalorder (!%p2289_p13), %s2281_s22, 0 }
  0x62   : > { %229 = sbr.rel (%p2289_p13) target bundleno = 679 (0x2a7), region = 32  ;;  %s1312_s8 = sshll.u32 (!%p2289_p13), %s231_s9, 7 }
  0x63   : > { %s232_s11 = scalar_lea.sflag (!%p2289_p13), [#allocation4], %s231_s9  ;;  %s2073_s28 = scalar_lea.vmem (!%p2289_p13), [#allocation3], %s1312_s8 }
  0x69   : > { %1817 = dma.done.wait (%p2290_p12), %s232_s11, 2048  }
  0x6a   : > { %1819 = vsyncadd (%p2290_p12), %s232_s11, 4294965248  ;;  %s240_s30 = sand.u32 1, %s1913_s18   ;;  %s2080_s7 = scalar_lea.vmem [#allocation6], %s1312_s8 }
  0x6b   : > { %s241_s27 = scalar_lea.sflag [#allocation7], %s240_s30 }
  0x6c   : > { %1821 = dma.done.wait (%p2290_p12), %s241_s27, 4096  }
  0x6d   : > { %1823 = vsyncadd (%p2290_p12), %s241_s27, 4294963200  ;;  %s2086_s12 = scalar_lea.vmem [#allocation8], %s1312_s8  ;;  %p1315_p9 = scmp.ne.s32.totalorder %s1842_s15, 0 }
  0x6e   : > { %v1860_v0 = vmov (!%p1315_p9), 0.0  }
  0x6f   : > { %291 = sbr.rel (%p1315_p9) target bundleno = 127 (0x7f), region = 48  ;;  %292 = vst [vmem:[#allocation2] sm:$0xff] (!%p1315_p9), %v1860_v0  ;;  %293 = vst [vmem:[#allocation2 + $0x8] sm:$0xff] (!%p1315_p9), %v1860_v0 }
  0x70   : > { %294 = vst [vmem:[#allocation2 + $0x10] sm:$0xff] (!%p1315_p9), %v1860_v0  ;;  %295 = vst [vmem:[#allocation2 + $0x18] sm:$0xff] (!%p1315_p9), %v1860_v0 }
  0x71   : > { %296 = vst [vmem:[#allocation2 + $0x20] sm:$0xff] (!%p1315_p9), %v1860_v0  ;;  %297 = vst [vmem:[#allocation2 + $0x28] sm:$0xff] (!%p1315_p9), %v1860_v0 }
  0x72   : > { %298 = vst [vmem:[#allocation2 + $0x30] sm:$0xff] (!%p1315_p9), %v1860_v0  ;;  %299 = vst [vmem:[#allocation2 + $0x38] sm:$0xff] (!%p1315_p9), %v1860_v0 }
  0x73   : > { %300 = vst [vmem:[#allocation2 + $0x40] sm:$0xff] (!%p1315_p9), %v1860_v0  ;;  %301 = vst [vmem:[#allocation2 + $0x48] sm:$0xff] (!%p1315_p9), %v1860_v0 }
  0x74   : > { %302 = vst [vmem:[#allocation2 + $0x50] sm:$0xff] (!%p1315_p9), %v1860_v0  ;;  %303 = vst [vmem:[#allocation2 + $0x58] sm:$0xff] (!%p1315_p9), %v1860_v0 }
  0x75   : > { %304 = vst [vmem:[#allocation2 + $0x60] sm:$0xff] (!%p1315_p9), %v1860_v0  ;;  %305 = vst [vmem:[#allocation2 + $0x68] sm:$0xff] (!%p1315_p9), %v1860_v0 }
  0x76   : > { %306 = vst [vmem:[#allocation2 + $0x70] sm:$0xff] %v1860_v0  ;;  %307 = vst [vmem:[#allocation2 + $0x78] sm:$0xff] %v1860_v0 }
  0x77   : > { %308 = vst [vmem:[#allocation2 + $0x80] sm:$0xff] %v1860_v0  ;;  %309 = vst [vmem:[#allocation2 + $0x88] sm:$0xff] %v1860_v0 }
  0x78   : > { %310 = vst [vmem:[#allocation2 + $0x90] sm:$0xff] %v1860_v0  ;;  %311 = vst [vmem:[#allocation2 + $0x98] sm:$0xff] %v1860_v0 }
  0x79   : > { %312 = vst [vmem:[#allocation2 + $0xa0] sm:$0xff] %v1860_v0  ;;  %313 = vst [vmem:[#allocation2 + $0xa8] sm:$0xff] %v1860_v0 }
  0x7a   : > { %314 = vst [vmem:[#allocation2 + $0xb0] sm:$0xff] %v1860_v0  ;;  %315 = vst [vmem:[#allocation2 + $0xb8] sm:$0xff] %v1860_v0 }
  0x7b   : > { %316 = vst [vmem:[#allocation2 + $0xc0] sm:$0xff] %v1860_v0  ;;  %317 = vst [vmem:[#allocation2 + $0xc8] sm:$0xff] %v1860_v0 }
  0x7c   : > { %318 = vst [vmem:[#allocation2 + $0xd0] sm:$0xff] %v1860_v0  ;;  %319 = vst [vmem:[#allocation2 + $0xd8] sm:$0xff] %v1860_v0 }
  0x7d   : > { %320 = vst [vmem:[#allocation2 + $0xe0] sm:$0xff] %v1860_v0  ;;  %321 = vst [vmem:[#allocation2 + $0xe8] sm:$0xff] %v1860_v0 }
  0x7e   : > { %322 = vst [vmem:[#allocation2 + $0xf0] sm:$0xff] %v1860_v0  ;;  %323 = vst [vmem:[#allocation2 + $0xf8] sm:$0xff] %v1860_v0 }
  0x7f PF: > { %v1580_v1 = vld [vmem:[%s2086_s12 + $0x40] sm:$0xff]   ;;  %v1582_v3 = vld [vmem:[%s2086_s12 + $0x48] sm:$0xff]   ;;  %v1584_v5 = vld [vmem:[%s2086_s12 + $0x50] sm:$0xff]   ;;  %p1364_p3 = scmp.ne.s32.totalorder %s1842_s15, 2 }
  0x80   : > { %v1581_v2 = vld [vmem:[%s2086_s12] sm:$0xff]   ;;  %1372 = vmatprep.subr.bf16.mxu0 %v1580_v1  ;;  %1484 = vmatprep.subr.bf16.mxu1 %v1580_v1  ;;  %v1583_v4 = vld [vmem:[%s2086_s12 + $0x8] sm:$0xff]   ;;  %v1585_v6 = vld [vmem:[%s2086_s12 + $0x10] sm:$0xff]  }
  0x81   : > { %1373 = vmatpush3.bf16.msra.mxu0 %v1581_v2  ;;  %1492 = vmatpush3.bf16.msra.mxu1 %v1581_v2  ;;  %v1586_v7 = vld [vmem:[%s2086_s12 + $0x58] sm:$0xff]   ;;  %v1588_v9 = vld [vmem:[%s2086_s12 + $0x60] sm:$0xff]   ;;  %v1590_v11 = vld [vmem:[%s2086_s12 + $0x68] sm:$0xff]  }
  0x82   : > { %1374 = vmatprep.subr.bf16.mxu0 %v1582_v3  ;;  %1485 = vmatprep.subr.bf16.mxu1 %v1582_v3  ;;  %v1587_v8 = vld [vmem:[%s2086_s12 + $0x18] sm:$0xff]   ;;  %v1589_v10 = vld [vmem:[%s2086_s12 + $0x20] sm:$0xff]   ;;  %v1591_v14 = vld [vmem:[%s2086_s12 + $0x28] sm:$0xff]  }
  0x83   : > { %v1598_v12 = vld [vmem:[%s2073_s28 + $0x4] ss:$8 sps:$4 sm:$0xff]   ;;  %v1592_v15 = vld [vmem:[%s2086_s12 + $0x70] sm:$0xff]   ;;  %v1594_v17 = vld [vmem:[%s2086_s12 + $0x78] sm:$0xff]  }
  0x84   : > { %v1601_v13 = vld [vmem:[%s2080_s7 + $0x4] ss:$8 sps:$4 sm:$0xff]   ;;  %708 = vmatprep.mubr.bf16.mxu0 %v1598_v12  ;;  %v1593_v16 = vld [vmem:[%s2086_s12 + $0x30] sm:$0xff]   ;;  %v1595_v18 = vld [vmem:[%s2086_s12 + $0x38] sm:$0xff]  }
  0x85   : > { %1375 = vmatpush3.bf16.msra.mxu0 %v1583_v4  ;;  %1493 = vmatpush3.bf16.msra.mxu1 %v1583_v4  ;;  %v1596_v19 = vld [vmem:[%s2073_s28] ss:$8 sps:$4 sm:$0xff]   ;;  %v1602_v21 = vld [vmem:[%s2073_s28 + $0x14] ss:$8 sps:$4 sm:$0xff]   ;;  %v1606_v23 = vld [vmem:[%s2073_s28 + $0x10] ss:$8 sps:$4 sm:$0xff]  }
  0x86   : > { %1376 = vmatprep.subr.bf16.mxu0 %v1584_v5  ;;  %1486 = vmatprep.subr.bf16.mxu1 %v1584_v5  ;;  %v1599_v20 = vld [vmem:[%s2080_s7] ss:$8 sps:$4 sm:$0xff]   ;;  %v1604_v22 = vld [vmem:[%s2080_s7 + $0x14] ss:$8 sps:$4 sm:$0xff]   ;;  %v1607_v24 = vld [vmem:[%s2080_s7 + $0x10] ss:$8 sps:$4 sm:$0xff]  }
  0x87   : > { %772 = vmatprep.mubr.bf16.mxu1 %v1601_v13  ;;  %v1608_v25 = vld [vmem:[%s2073_s28 + $0x24] ss:$8 sps:$4 sm:$0xff]   ;;  %v1612_v27 = vld [vmem:[%s2073_s28 + $0x20] ss:$8 sps:$4 sm:$0xff]   ;;  %v1614_v29 = vld [vmem:[%s2073_s28 + $0x34] ss:$8 sps:$4 sm:$0xff]  }
  0x88   : > { %v1610_v26 = vld [vmem:[%s2080_s7 + $0x24] ss:$8 sps:$4 sm:$0xff]   ;;  %v1613_v28 = vld [vmem:[%s2080_s7 + $0x20] ss:$8 sps:$4 sm:$0xff]   ;;  %v1616_v30 = vld [vmem:[%s2080_s7 + $0x34] ss:$8 sps:$4 sm:$0xff]  }
  0x89   : > { %1377 = vmatpush3.bf16.msra.mxu0 %v1585_v6  ;;  %1494 = vmatpush3.bf16.msra.mxu1 %v1585_v6  ;;  %v1618_v31 = vld [vmem:[%s2073_s28 + $0x30] ss:$8 sps:$4 sm:$0xff]   ;;  %v1620_v33 = vld [vmem:[%s2073_s28 + $0x44] ss:$8 sps:$4 sm:$0xff]   ;;  %v1624_v35 = vld [vmem:[%s2073_s28 + $0x40] ss:$8 sps:$4 sm:$0xff]  }
  0x8a   : > { %1378 = vmatprep.subr.bf16.mxu0 %v1586_v7  ;;  %1487 = vmatprep.subr.bf16.mxu1 %v1586_v7  ;;  %v1619_v32 = vld [vmem:[%s2080_s7 + $0x30] ss:$8 sps:$4 sm:$0xff]   ;;  %v1622_v34 = vld [vmem:[%s2080_s7 + $0x44] ss:$8 sps:$4 sm:$0xff]   ;;  %v1625_v36 = vld [vmem:[%s2080_s7 + $0x40] ss:$8 sps:$4 sm:$0xff]  }
  0x8b   : > { %v1626_v37 = vld [vmem:[%s2073_s28 + $0x54] ss:$8 sps:$4 sm:$0xff]   ;;  %v1630_v39 = vld [vmem:[%s2073_s28 + $0x50] ss:$8 sps:$4 sm:$0xff]   ;;  %v1632_v41 = vld [vmem:[%s2073_s28 + $0x64] ss:$8 sps:$4 sm:$0xff]  }
  0x8c   : > { %v1628_v38 = vld [vmem:[%s2080_s7 + $0x54] ss:$8 sps:$4 sm:$0xff]   ;;  %v1631_v40 = vld [vmem:[%s2080_s7 + $0x50] ss:$8 sps:$4 sm:$0xff]   ;;  %v1634_v42 = vld [vmem:[%s2080_s7 + $0x64] ss:$8 sps:$4 sm:$0xff]  }
  0x8d   : > { %1379 = vmatpush3.bf16.msra.mxu0 %v1587_v8  ;;  %1495 = vmatpush3.bf16.msra.mxu1 %v1587_v8  ;;  %v1636_v43 = vld [vmem:[%s2073_s28 + $0x60] ss:$8 sps:$4 sm:$0xff]   ;;  %v1638_v45 = vld [vmem:[%s2073_s28 + $0x74] ss:$8 sps:$4 sm:$0xff]   ;;  %v1642_v47 = vld [vmem:[%s2073_s28 + $0x70] ss:$8 sps:$4 sm:$0xff]  }
  0x8e   : > { %1380 = vmatprep.subr.bf16.mxu0 %v1588_v9  ;;  %1488 = vmatprep.subr.bf16.mxu1 %v1588_v9  ;;  %v1637_v44 = vld [vmem:[%s2080_s7 + $0x60] ss:$8 sps:$4 sm:$0xff]   ;;  %v1640_v46 = vld [vmem:[%s2080_s7 + $0x74] ss:$8 sps:$4 sm:$0xff]   ;;  %v1643_v48 = vld [vmem:[%s2080_s7 + $0x70] ss:$8 sps:$4 sm:$0xff]  }
  0x8f   : > { %v516_v51 = vld [vmem:[#allocation2] sm:$0xff]  ;;  %v517_v59 = vld [vmem:[#allocation2 + $0x8] sm:$0xff]  ;;  %v518_v7 = vld [vmem:[#allocation2 + $0x10] sm:$0xff] }
  0x90   : > { %v532_v53 = vld [vmem:[#allocation2 + $0x80] sm:$0xff]  ;;  %v533_v61 = vld [vmem:[#allocation2 + $0x88] sm:$0xff]  ;;  %v534_v9 = vld [vmem:[#allocation2 + $0x90] sm:$0xff] }
  0x91   : > { %1381 = vmatpush3.bf16.msra.mxu0 %v1589_v10  ;;  %1496 = vmatpush3.bf16.msra.mxu1 %v1589_v10 }
  0x92   : > { %1382 = vmatprep.subr.bf16.mxu0 %v1590_v11  ;;  %1489 = vmatprep.subr.bf16.mxu1 %v1590_v11 }
  0x95   : > { %1383 = vmatpush3.bf16.msra.mxu0 %v1591_v14  ;;  %1497 = vmatpush3.bf16.msra.mxu1 %v1591_v14 }
  0x96   : > { %1384 = vmatprep.subr.bf16.mxu0 %v1592_v15  ;;  %1490 = vmatprep.subr.bf16.mxu1 %v1592_v15  ;;  %v519_v15 = vld [vmem:[#allocation2 + $0x18] sm:$0xff] }
  0x99   : > { %1385 = vmatpush3.bf16.msra.mxu0 %v1593_v16  ;;  %1498 = vmatpush3.bf16.msra.mxu1 %v1593_v16 }
  0x9a   : > { %1386 = vmatprep.subr.bf16.mxu0 %v1594_v17  ;;  %1491 = vmatprep.subr.bf16.mxu1 %v1594_v17  ;;  %v535_v17 = vld [vmem:[#allocation2 + $0x98] sm:$0xff] }
  0x9d   : > { %1387 = vmatpush3.bf16.msra.mxu0 %v1595_v18  ;;  %1499 = vmatpush3.bf16.msra.mxu1 %v1595_v18 }
  0xa0   : > { %709 = vmatmul.mubr.bf16.vlgmr.msra.gmra.mrb[0].mxu0 %v1596_v19  ;;  %773 = vmatmul.mubr.bf16.vlgmr.msra.gmra.mrb[0].mxu1 %v1599_v20 }
  0xa1   : > { %716 = vmatprep.mubr.bf16.mxu0 %v1602_v21  ;;  %780 = vmatprep.mubr.bf16.mxu1 %v1604_v22 }
  0xa8   : > { %717 = vmatmul.mubr.bf16.gmra.mrb[4].mxu0 %v1606_v23  ;;  %781 = vmatmul.mubr.bf16.gmra.mrb[4].mxu1 %v1607_v24 }
  0xa9   : > { %724 = vmatprep.mubr.bf16.mxu0 %v1608_v25  ;;  %788 = vmatprep.mubr.bf16.mxu1 %v1610_v26 }
  0xb0   : > { %725 = vmatmul.mubr.bf16.gmra.mrb[8].mxu0 %v1612_v27  ;;  %789 = vmatmul.mubr.bf16.gmra.mrb[8].mxu1 %v1613_v28  ;;  %v520_v27 = vld [vmem:[#allocation2 + $0x20] sm:$0xff] }
  0xb1   : > { %732 = vmatprep.mubr.bf16.mxu0 %v1614_v29  ;;  %796 = vmatprep.mubr.bf16.mxu1 %v1616_v30  ;;  %v536_v29 = vld [vmem:[#allocation2 + $0xa0] sm:$0xff] }
  0xb8   : > { %733 = vmatmul.mubr.bf16.gmra.mrb[12].mxu0 %v1618_v31  ;;  %797 = vmatmul.mubr.bf16.gmra.mrb[12].mxu1 %v1619_v32 }
  0xb9   : > { %740 = vmatprep.mubr.bf16.mxu0 %v1620_v33  ;;  %804 = vmatprep.mubr.bf16.mxu1 %v1622_v34 }
  0xc0   : > { %741 = vmatmul.mubr.bf16.gmra.mrb[16].mxu0 %v1624_v35  ;;  %805 = vmatmul.mubr.bf16.gmra.mrb[16].mxu1 %v1625_v36  ;;  %v521_v35 = vld [vmem:[#allocation2 + $0x28] sm:$0xff] }
  0xc1   : > { %748 = vmatprep.mubr.bf16.mxu0 %v1626_v37  ;;  %812 = vmatprep.mubr.bf16.mxu1 %v1628_v38  ;;  %v537_v37 = vld [vmem:[#allocation2 + $0xa8] sm:$0xff] }
  0xc8   : > { %749 = vmatmul.mubr.bf16.gmra.mrb[20].mxu0 %v1630_v39  ;;  %813 = vmatmul.mubr.bf16.gmra.mrb[20].mxu1 %v1631_v40 }
  0xc9   : > { %756 = vmatprep.mubr.bf16.mxu0 %v1632_v41  ;;  %820 = vmatprep.mubr.bf16.mxu1 %v1634_v42 }
  0xd0   : > { %757 = vmatmul.mubr.bf16.gmra.mrb[24].mxu0 %v1636_v43  ;;  %821 = vmatmul.mubr.bf16.gmra.mrb[24].mxu1 %v1637_v44 }
  0xd1   : > { %764 = vmatprep.mubr.bf16.mxu0 %v1638_v45  ;;  %828 = vmatprep.mubr.bf16.mxu1 %v1640_v46 }
  0xd8   : > { %765 = vmatmul.mubr.bf16.gmra.mrb[28].mxu0 %v1642_v47  ;;  %829 = vmatmul.mubr.bf16.gmra.mrb[28].mxu1 %v1643_v48  ;;  %v522_v47 = vld [vmem:[#allocation2 + $0x30] sm:$0xff] }
 0x173   : > { %v1388_v49 = vpop.f32.mrb[0].mxu0  ;;  %v1436_v50 = vpop.f32.mrb[0].mxu1 }
 0x174   : > { %v1389_v52 = vpop.f32.mrb[1].mxu0  ;;  %v1437_v54 = vpop.f32.mrb[1].mxu1 }
 0x175   : > { %v1390_v55 = vadd.f32 %v1389_v52, %v1388_v49  ;;  %v1438_v56 = vadd.f32 %v1437_v54, %v1436_v50  ;;  %v1391_v57 = vpop.f32.mrb[2].mxu0  ;;  %v1439_v58 = vpop.f32.mrb[2].mxu1  ;;  %v538_v49 = vld [vmem:[#allocation2 + $0xb0] sm:$0xff] }
 0x176   : > { %v1392_v60 = vpop.f32.mrb[3].mxu0  ;;  %v1440_v62 = vpop.f32.mrb[3].mxu1 }
 0x177   : > { %v837_v63 = vadd.f32 %v1390_v55, %v516_v51  ;;  %v853_v0 = vadd.f32 %v1438_v56, %v532_v53  ;;  %v1393_v1 = vadd.f32 %v1392_v60, %v1391_v57  ;;  %v1441_v2 = vadd.f32 %v1440_v62, %v1439_v58  ;;  %v523_v55 = vld [vmem:[#allocation2 + $0x38] sm:$0xff] }
 0x178   : > { %v539_v57 = vld [vmem:[#allocation2 + $0xb8] sm:$0xff] }
 0x179   : > { %869 = vst [vmem:[#allocation2] sm:$0xff] %v837_v63  ;;  %885 = vst [vmem:[#allocation2 + $0x80] sm:$0xff] %v853_v0  ;;  %v838_v3 = vadd.f32 %v1393_v1, %v517_v59  ;;  %v854_v4 = vadd.f32 %v1441_v2, %v533_v61 }
 0x17b   : > { %870 = vst [vmem:[#allocation2 + $0x8] sm:$0xff] %v838_v3  ;;  %886 = vst [vmem:[#allocation2 + $0x88] sm:$0xff] %v854_v4  ;;  %v1394_v5 = vpop.f32.mrb[4].mxu0  ;;  %v1442_v6 = vpop.f32.mrb[4].mxu1  ;;  %v524_v3 = vld [vmem:[#allocation2 + $0x40] sm:$0xff] }
 0x17c   : > { %v1395_v8 = vpop.f32.mrb[5].mxu0  ;;  %v1443_v10 = vpop.f32.mrb[5].mxu1 }
 0x17d   : > { %v1396_v11 = vadd.f32 %v1395_v8, %v1394_v5  ;;  %v1444_v12 = vadd.f32 %v1443_v10, %v1442_v6  ;;  %v1397_v13 = vpop.f32.mrb[6].mxu0  ;;  %v1445_v14 = vpop.f32.mrb[6].mxu1  ;;  %v540_v5 = vld [vmem:[#allocation2 + $0xc0] sm:$0xff] }
 0x17e   : > { %v1398_v16 = vpop.f32.mrb[7].mxu0  ;;  %v1446_v18 = vpop.f32.mrb[7].mxu1 }
 0x17f   : > { %v839_v19 = vadd.f32 %v1396_v11, %v518_v7  ;;  %v855_v20 = vadd.f32 %v1444_v12, %v534_v9  ;;  %v1399_v21 = vadd.f32 %v1398_v16, %v1397_v13  ;;  %v1447_v22 = vadd.f32 %v1446_v18, %v1445_v14  ;;  %v525_v11 = vld [vmem:[#allocation2 + $0x48] sm:$0xff] }
 0x180   : > { %v541_v13 = vld [vmem:[#allocation2 + $0xc8] sm:$0xff] }
 0x181   : > { %871 = vst [vmem:[#allocation2 + $0x10] sm:$0xff] %v839_v19  ;;  %887 = vst [vmem:[#allocation2 + $0x90] sm:$0xff] %v855_v20  ;;  %v840_v23 = vadd.f32 %v1399_v21, %v519_v15  ;;  %v856_v24 = vadd.f32 %v1447_v22, %v535_v17 }
 0x183   : > { %872 = vst [vmem:[#allocation2 + $0x18] sm:$0xff] %v840_v23  ;;  %888 = vst [vmem:[#allocation2 + $0x98] sm:$0xff] %v856_v24  ;;  %v1400_v25 = vpop.f32.mrb[8].mxu0  ;;  %v1448_v26 = vpop.f32.mrb[8].mxu1  ;;  %v526_v23 = vld [vmem:[#allocation2 + $0x50] sm:$0xff] }
 0x184   : > { %v1401_v28 = vpop.f32.mrb[9].mxu0  ;;  %v1449_v30 = vpop.f32.mrb[9].mxu1 }
 0x185   : > { %v1402_v31 = vadd.f32 %v1401_v28, %v1400_v25  ;;  %v1450_v32 = vadd.f32 %v1449_v30, %v1448_v26  ;;  %v1403_v33 = vpop.f32.mrb[10].mxu0  ;;  %v1451_v34 = vpop.f32.mrb[10].mxu1  ;;  %v542_v25 = vld [vmem:[#allocation2 + $0xd0] sm:$0xff] }
 0x186   : > { %v1404_v36 = vpop.f32.mrb[11].mxu0  ;;  %v1452_v38 = vpop.f32.mrb[11].mxu1 }
 0x187   : > { %v841_v39 = vadd.f32 %v1402_v31, %v520_v27  ;;  %v857_v40 = vadd.f32 %v1450_v32, %v536_v29  ;;  %v1405_v41 = vadd.f32 %v1404_v36, %v1403_v33  ;;  %v1453_v42 = vadd.f32 %v1452_v38, %v1451_v34  ;;  %v527_v31 = vld [vmem:[#allocation2 + $0x58] sm:$0xff] }
 0x188   : > { %v543_v33 = vld [vmem:[#allocation2 + $0xd8] sm:$0xff] }
 0x189   : > { %873 = vst [vmem:[#allocation2 + $0x20] sm:$0xff] %v841_v39  ;;  %889 = vst [vmem:[#allocation2 + $0xa0] sm:$0xff] %v857_v40  ;;  %v842_v43 = vadd.f32 %v1405_v41, %v521_v35  ;;  %v858_v44 = vadd.f32 %v1453_v42, %v537_v37 }
 0x18b   : > { %874 = vst [vmem:[#allocation2 + $0x28] sm:$0xff] %v842_v43  ;;  %890 = vst [vmem:[#allocation2 + $0xa8] sm:$0xff] %v858_v44  ;;  %v1406_v45 = vpop.f32.mrb[12].mxu0  ;;  %v1454_v46 = vpop.f32.mrb[12].mxu1  ;;  %v528_v43 = vld [vmem:[#allocation2 + $0x60] sm:$0xff] }
 0x18c   : > { %v1407_v48 = vpop.f32.mrb[13].mxu0  ;;  %v1455_v50 = vpop.f32.mrb[13].mxu1 }
 0x18d   : > { %v1408_v51 = vadd.f32 %v1407_v48, %v1406_v45  ;;  %v1456_v52 = vadd.f32 %v1455_v50, %v1454_v46  ;;  %v1409_v53 = vpop.f32.mrb[14].mxu0  ;;  %v1457_v54 = vpop.f32.mrb[14].mxu1  ;;  %v544_v45 = vld [vmem:[#allocation2 + $0xe0] sm:$0xff] }
 0x18e   : > { %v1410_v56 = vpop.f32.mrb[15].mxu0  ;;  %v1458_v58 = vpop.f32.mrb[15].mxu1 }
 0x18f   : > { %v843_v59 = vadd.f32 %v1408_v51, %v522_v47  ;;  %v859_v60 = vadd.f32 %v1456_v52, %v538_v49  ;;  %v1411_v61 = vadd.f32 %v1410_v56, %v1409_v53  ;;  %v1459_v62 = vadd.f32 %v1458_v58, %v1457_v54  ;;  %v529_v51 = vld [vmem:[#allocation2 + $0x68] sm:$0xff] }
 0x190   : > { %v545_v53 = vld [vmem:[#allocation2 + $0xe8] sm:$0xff] }
 0x191   : > { %875 = vst [vmem:[#allocation2 + $0x30] sm:$0xff] %v843_v59  ;;  %891 = vst [vmem:[#allocation2 + $0xb0] sm:$0xff] %v859_v60  ;;  %v844_v63 = vadd.f32 %v1411_v61, %v523_v55  ;;  %v860_v0 = vadd.f32 %v1459_v62, %v539_v57 }
 0x193   : > { %876 = vst [vmem:[#allocation2 + $0x38] sm:$0xff] %v844_v63  ;;  %892 = vst [vmem:[#allocation2 + $0xb8] sm:$0xff] %v860_v0  ;;  %v1412_v1 = vpop.f32.mrb[16].mxu0  ;;  %v1460_v2 = vpop.f32.mrb[16].mxu1  ;;  %v530_v63 = vld [vmem:[#allocation2 + $0x70] sm:$0xff] }
 0x194   : > { %v1413_v4 = vpop.f32.mrb[17].mxu0  ;;  %v1461_v6 = vpop.f32.mrb[17].mxu1 }
 0x195   : > { %v1414_v7 = vadd.f32 %v1413_v4, %v1412_v1  ;;  %v1462_v8 = vadd.f32 %v1461_v6, %v1460_v2  ;;  %v1415_v9 = vpop.f32.mrb[18].mxu0  ;;  %v1463_v10 = vpop.f32.mrb[18].mxu1  ;;  %v546_v1 = vld [vmem:[#allocation2 + $0xf0] sm:$0xff] }
 0x196   : > { %v1416_v12 = vpop.f32.mrb[19].mxu0  ;;  %v1464_v14 = vpop.f32.mrb[19].mxu1 }
 0x197   : > { %v845_v15 = vadd.f32 %v1414_v7, %v524_v3  ;;  %v861_v16 = vadd.f32 %v1462_v8, %v540_v5  ;;  %v1417_v17 = vadd.f32 %v1416_v12, %v1415_v9  ;;  %v1465_v18 = vadd.f32 %v1464_v14, %v1463_v10  ;;  %v531_v7 = vld [vmem:[#allocation2 + $0x78] sm:$0xff] }
 0x198   : > { %v547_v9 = vld [vmem:[#allocation2 + $0xf8] sm:$0xff] }
 0x199   : > { %877 = vst [vmem:[#allocation2 + $0x40] sm:$0xff] %v845_v15  ;;  %893 = vst [vmem:[#allocation2 + $0xc0] sm:$0xff] %v861_v16  ;;  %v846_v19 = vadd.f32 %v1417_v17, %v525_v11  ;;  %v862_v20 = vadd.f32 %v1465_v18, %v541_v13  ;;  %v907_v17 = vld [vmem:[#allocation2 + $0x10] sm:$0xff] (!%p1364_p3) }
 0x19a   : > { %v2138_v18 = vld [vmem:[#allocation2 + $0x90] sm:$0xff] (!%p1364_p3) }
 0x19b   : > { %878 = vst [vmem:[#allocation2 + $0x48] sm:$0xff] %v846_v19  ;;  %894 = vst [vmem:[#allocation2 + $0xc8] sm:$0xff] %v862_v20  ;;  %v1418_v21 = vpop.f32.mrb[20].mxu0  ;;  %v1466_v22 = vpop.f32.mrb[20].mxu1  ;;  %v905_v19 = vld [vmem:[#allocation2] sm:$0xff] (!%p1364_p3)  ;;  %v939_v20 = vmul.f32 (!%p1364_p3), %v2138_v18, %v907_v17 }
 0x19c   : > { %v1419_v24 = vpop.f32.mrb[21].mxu0  ;;  %v1467_v26 = vpop.f32.mrb[21].mxu1 }
 0x19d   : > { %v1420_v27 = vadd.f32 %v1419_v24, %v1418_v21  ;;  %v1468_v28 = vadd.f32 %v1467_v26, %v1466_v22  ;;  %v1421_v29 = vpop.f32.mrb[22].mxu0  ;;  %v1469_v30 = vpop.f32.mrb[22].mxu1  ;;  %v921_v21 = vld [vmem:[#allocation2 + $0x80] sm:$0xff] (!%p1364_p3)  ;;  %v908_v22 = vld [vmem:[#allocation2 + $0x18] sm:$0xff] (!%p1364_p3)  ;;  %v922_v26 = vld [vmem:[#allocation2 + $0x88] sm:$0xff] (!%p1364_p3)  ;;  %957 = vadd.xlane.f32.xlu1 (!%p1364_p3), %v939_v20 }
 0x19e   : > { %v1422_v32 = vpop.f32.mrb[23].mxu0  ;;  %v1470_v34 = vpop.f32.mrb[23].mxu1  ;;  %v937_v24 = vmul.f32 (!%p1364_p3), %v921_v21, %v905_v19 }
 0x19f   : > { %v847_v35 = vadd.f32 %v1420_v27, %v526_v23  ;;  %v863_v36 = vadd.f32 %v1468_v28, %v542_v25  ;;  %v1423_v37 = vadd.f32 %v1422_v32, %v1421_v29  ;;  %v1471_v38 = vadd.f32 %v1470_v34, %v1469_v30  ;;  %v924_v23 = vld [vmem:[#allocation2 + $0x98] sm:$0xff] (!%p1364_p3)  ;;  %v906_v25 = vld [vmem:[#allocation2 + $0x8] sm:$0xff] (!%p1364_p3)  ;;  %v2143_v34 = vld [vmem:[#allocation2 + $0x20] sm:$0xff] (!%p1364_p3) }
 0x1a0   : > { %v940_v27 = vmul.f32 (!%p1364_p3), %v924_v23, %v908_v22  ;;  %953 = vadd.xlane.f32.xlu0 (!%p1364_p3), %v937_v24  ;;  %v938_v28 = vmul.f32 (!%p1364_p3), %v922_v26, %v906_v25  ;;  %v986_v29 = vmul.f32 (!%p1364_p3), %v906_v25, %v906_v25  ;;  %v985_v30 = vmul.f32 (!%p1364_p3), %v905_v19, %v905_v19 }
 0x1a1   : > { %879 = vst [vmem:[#allocation2 + $0x50] sm:$0xff] %v847_v35  ;;  %895 = vst [vmem:[#allocation2 + $0xd0] sm:$0xff] %v863_v36  ;;  %v848_v39 = vadd.f32 %v1423_v37, %v527_v31  ;;  %v864_v40 = vadd.f32 %v1471_v38, %v543_v33  ;;  %v988_v31 = vmul.f32 (!%p1364_p3), %v908_v22, %v908_v22  ;;  %v2141_v33 = vld [vmem:[#allocation2 + $0x28] sm:$0xff] (!%p1364_p3)  ;;  %v2149_v37 = vld [vmem:[#allocation2 + $0x38] sm:$0xff] (!%p1364_p3) }
 0x1a2   : > { %959 = vadd.xlane.f32.xlu1 (!%p1364_p3), %v940_v27  ;;  %v987_v32 = vmul.f32 (!%p1364_p3), %v907_v17, %v907_v17  ;;  %v990_v35 = vmul.f32 (!%p1364_p3), %v2141_v33, %v2141_v33  ;;  %v989_v36 = vmul.f32 (!%p1364_p3), %v2143_v34, %v2143_v34  ;;  %v2151_v38 = vld [vmem:[#allocation2 + $0x30] sm:$0xff] (!%p1364_p3) }
 0x1a3   : > { %880 = vst [vmem:[#allocation2 + $0x58] sm:$0xff] %v848_v39  ;;  %896 = vst [vmem:[#allocation2 + $0xd8] sm:$0xff] %v864_v40  ;;  %v1424_v41 = vpop.f32.mrb[24].mxu0  ;;  %v1472_v42 = vpop.f32.mrb[24].mxu1  ;;  %v992_v39 = vmul.f32 (!%p1364_p3), %v2149_v37, %v2149_v37  ;;  %v991_v40 = vmul.f32 (!%p1364_p3), %v2151_v38, %v2151_v38 }
 0x1a4   : > { %v1425_v44 = vpop.f32.mrb[25].mxu0  ;;  %v1473_v46 = vpop.f32.mrb[25].mxu1  ;;  %955 = vadd.xlane.f32.xlu0 (!%p1364_p3), %v938_v28 }
 0x1a5   : > { %v1426_v47 = vadd.f32 %v1425_v44, %v1424_v41  ;;  %v1474_v48 = vadd.f32 %v1473_v46, %v1472_v42  ;;  %v1427_v49 = vpop.f32.mrb[26].mxu0  ;;  %v1475_v50 = vpop.f32.mrb[26].mxu1  ;;  %v2157_v41 = vld [vmem:[#allocation2 + $0x48] sm:$0xff] (!%p1364_p3)  ;;  %v2159_v42 = vld [vmem:[#allocation2 + $0x40] sm:$0xff] (!%p1364_p3) }
 0x1a6   : > { %v1428_v52 = vpop.f32.mrb[27].mxu0  ;;  %v1476_v54 = vpop.f32.mrb[27].mxu1  ;;  %1003 = vadd.xlane.f32.xlu1 (!%p1364_p3), %v986_v29  ;;  %v993_v44 = vmul.f32 (!%p1364_p3), %v2159_v42, %v2159_v42 }
 0x1a7   : > { %v849_v55 = vadd.f32 %v1426_v47, %v528_v43  ;;  %v865_v56 = vadd.f32 %v1474_v48, %v544_v45  ;;  %v1429_v57 = vadd.f32 %v1428_v52, %v1427_v49  ;;  %v1477_v58 = vadd.f32 %v1476_v54, %v1475_v50 }
 0x1a8   : > { %1001 = vadd.xlane.f32.xlu0 (!%p1364_p3), %v985_v30  ;;  %v994_v43 = vmul.f32 (!%p1364_p3), %v2157_v41, %v2157_v41  ;;  %v2167_v46 = vld [vmem:[#allocation2 + $0x50] sm:$0xff] (!%p1364_p3) }
 0x1a9   : > { %881 = vst [vmem:[#allocation2 + $0x60] sm:$0xff] %v849_v55  ;;  %897 = vst [vmem:[#allocation2 + $0xe0] sm:$0xff] %v865_v56  ;;  %v850_v59 = vadd.f32 %v1429_v57, %v529_v51  ;;  %v866_v60 = vadd.f32 %v1477_v58, %v545_v53  ;;  %v995_v48 = vmul.f32 (!%p1364_p3), %v2167_v46, %v2167_v46 }
 0x1aa   : > { %1007 = vadd.xlane.f32.xlu1 (!%p1364_p3), %v988_v31  ;;  %v2165_v45 = vld [vmem:[#allocation2 + $0x58] sm:$0xff] (!%p1364_p3)  ;;  %v1034_v57 = vmul.f32 (!%p1364_p3), %v922_v26, %v922_v26  ;;  %v1033_v58 = vmul.f32 (!%p1364_p3), %v921_v21, %v921_v21 }
 0x1ab   : > { %882 = vst [vmem:[#allocation2 + $0x68] sm:$0xff] %v850_v59  ;;  %898 = vst [vmem:[#allocation2 + $0xe8] sm:$0xff] %v866_v60  ;;  %v1430_v61 = vpop.f32.mrb[28].mxu0  ;;  %v1478_v62 = vpop.f32.mrb[28].mxu1  ;;  %v996_v47 = vmul.f32 (!%p1364_p3), %v2165_v45, %v2165_v45  ;;  %v1036_v59 = vmul.f32 (!%p1364_p3), %v924_v23, %v924_v23  ;;  %v1035_v60 = vmul.f32 (!%p1364_p3), %v2138_v18, %v2138_v18 }
 0x1ac   : > { %v1431_v0 = vpop.f32.mrb[29].mxu0  ;;  %v1479_v2 = vpop.f32.mrb[29].mxu1  ;;  %1005 = vadd.xlane.f32.xlu0 (!%p1364_p3), %v987_v32 }
 0x1ad   : > { %v1432_v3 = vadd.f32 %v1431_v0, %v1430_v61  ;;  %v1480_v4 = vadd.f32 %v1479_v2, %v1478_v62  ;;  %v1433_v5 = vpop.f32.mrb[30].mxu0  ;;  %v1481_v6 = vpop.f32.mrb[30].mxu1  ;;  %904 = sbr.rel (%p1364_p3) target bundleno = 653 (0x28d), region = 52  ;;  %v926_v61 = vld [vmem:[#allocation2 + $0xa8] sm:$0xff] (!%p1364_p3)  ;;  %v925_v62 = vld [vmem:[#allocation2 + $0xa0] sm:$0xff] (!%p1364_p3)  ;;  %v927_v2 = vld [vmem:[#allocation2 + $0xb0] sm:$0xff] (!%p1364_p3) }
 0x1ae   : > { %v1434_v8 = vpop.f32.mrb[31].mxu0  ;;  %v1482_v10 = vpop.f32.mrb[31].mxu1  ;;  %1011 = vadd.xlane.f32.xlu1 (!%p1364_p3), %v990_v35  ;;  %v1037_v0 = vmul.f32 (!%p1364_p3), %v925_v62, %v925_v62  ;;  %v942_v21 = vmul.f32 (!%p1364_p3), %v926_v61, %v2141_v33  ;;  %v941_v22 = vmul.f32 (!%p1364_p3), %v925_v62, %v2143_v34  ;;  %v943_v24 = vmul.f32 (!%p1364_p3), %v927_v2, %v2151_v38 }
 0x1af   : > { %v851_v11 = vadd.f32 %v1432_v3, %v530_v63  ;;  %v867_v12 = vadd.f32 %v1480_v4, %v546_v1  ;;  %v1435_v13 = vadd.f32 %v1434_v8, %v1433_v5  ;;  %v1483_v14 = vadd.f32 %v1482_v10, %v1481_v6  ;;  %v928_v1 = vld [vmem:[#allocation2 + $0xb8] sm:$0xff] (!%p1364_p3)  ;;  %v930_v5 = vld [vmem:[#allocation2 + $0xc8] sm:$0xff] (!%p1364_p3)  ;;  %v929_v6 = vld [vmem:[#allocation2 + $0xc0] sm:$0xff] (!%p1364_p3) }
 0x1b0   : > { %1009 = vadd.xlane.f32.xlu0 (!%p1364_p3), %v989_v36  ;;  %v2175_v50 = vld [vmem:[#allocation2 + $0x60] sm:$0xff] (!%p1364_p3)  ;;  %v1038_v63 = vmul.f32 (!%p1364_p3), %v926_v61, %v926_v61  ;;  %v1040_v3 = vmul.f32 (!%p1364_p3), %v928_v1, %v928_v1  ;;  %v1039_v4 = vmul.f32 (!%p1364_p3), %v927_v2, %v927_v2  ;;  %v1041_v8 = vmul.f32 (!%p1364_p3), %v929_v6, %v929_v6  ;;  %v931_v10 = vld [vmem:[#allocation2 + $0xd0] sm:$0xff] (!%p1364_p3) }
 0x1b1   : > { %883 = vst [vmem:[#allocation2 + $0x70] sm:$0xff] %v851_v11  ;;  %899 = vst [vmem:[#allocation2 + $0xf0] sm:$0xff] %v867_v12  ;;  %v852_v15 = vadd.f32 %v1435_v13, %v531_v7  ;;  %v868_v16 = vadd.f32 %v1483_v14, %v547_v9  ;;  %v997_v52 = vmul.f32 (!%p1364_p3), %v2175_v50, %v2175_v50  ;;  %v932_v9 = vld [vmem:[#allocation2 + $0xd8] sm:$0xff] (!%p1364_p3)  ;;  %v933_v14 = vld [vmem:[#allocation2 + $0xe0] sm:$0xff] (!%p1364_p3) }
 0x1b2   : > { %1015 = vadd.xlane.f32.xlu1 (!%p1364_p3), %v992_v39  ;;  %v2173_v49 = vld [vmem:[#allocation2 + $0x68] sm:$0xff] (!%p1364_p3)  ;;  %v1042_v7 = vmul.f32 (!%p1364_p3), %v930_v5, %v930_v5  ;;  %v1044_v11 = vmul.f32 (!%p1364_p3), %v932_v9, %v932_v9  ;;  %v1043_v12 = vmul.f32 (!%p1364_p3), %v931_v10, %v931_v10  ;;  %v944_v23 = vmul.f32 (!%p1364_p3), %v928_v1, %v2149_v37 }
 0x1b3   : > { %884 = vst [vmem:[#allocation2 + $0x78] sm:$0xff] %v852_v15  ;;  %900 = vst [vmem:[#allocation2 + $0xf8] sm:$0xff] %v868_v16  ;;  %v998_v51 = vmul.f32 (!%p1364_p3), %v2173_v49, %v2173_v49  ;;  %v934_v13 = vld [vmem:[#allocation2 + $0xe8] sm:$0xff] (!%p1364_p3)  ;;  %v1045_v16 = vmul.f32 (!%p1364_p3), %v933_v14, %v933_v14  ;;  %v946_v25 = vmul.f32 (!%p1364_p3), %v930_v5, %v2157_v41 }
 0x1b4   : > { %1013 = vadd.xlane.f32.xlu0 %v991_v40  ;;  %v1046_v15 = vmul.f32 %v934_v13, %v934_v13  ;;  %v945_v26 = vmul.f32 %v929_v6, %v2159_v42  ;;  %v948_v27 = vmul.f32 %v932_v9, %v2165_v45  ;;  %v947_v28 = vmul.f32 %v931_v10, %v2167_v46 }
 0x1b5   : > { %v950_v29 = vmul.f32 %v934_v13, %v2173_v49  ;;  %v949_v30 = vmul.f32 %v933_v14, %v2175_v50 }
 0x1b6   : > { %1019 = vadd.xlane.f32.xlu1 %v994_v43 }
 0x1b8   : > { %1017 = vadd.xlane.f32.xlu0 %v993_v44  ;;  %v2183_v54 = vld [vmem:[#allocation2 + $0x70] sm:$0xff] }
 0x1b9   : > { %v999_v56 = vmul.f32 %v2183_v54, %v2183_v54  ;;  %v935_v18 = vld [vmem:[#allocation2 + $0xf0] sm:$0xff] }
 0x1ba   : > { %1023 = vadd.xlane.f32.xlu1 %v996_v47  ;;  %v2181_v53 = vld [vmem:[#allocation2 + $0x78] sm:$0xff]  ;;  %v1047_v20 = vmul.f32 %v935_v18, %v935_v18  ;;  %v951_v32 = vmul.f32 %v935_v18, %v2183_v54 }
 0x1bb   : > { %v1000_v55 = vmul.f32 %v2181_v53, %v2181_v53  ;;  %v936_v17 = vld [vmem:[#allocation2 + $0xf8] sm:$0xff] }
 0x1bc   : > { %1021 = vadd.xlane.f32.xlu0 %v995_v48  ;;  %v1048_v19 = vmul.f32 %v936_v17, %v936_v17  ;;  %v952_v31 = vmul.f32 %v936_v17, %v2181_v53 }
 0x1be   : > { %1027 = vadd.xlane.f32.xlu1 %v998_v51 }
 0x1c0   : > { %1025 = vadd.xlane.f32.xlu0 %v997_v52 }
 0x1c2   : > { %1031 = vadd.xlane.f32.xlu1 %v1000_v55 }
 0x1c4   : > { %1029 = vadd.xlane.f32.xlu0 %v999_v56 }
 0x1c6   : > { %1051 = vadd.xlane.f32.xlu1 %v1034_v57 }
 0x1c8   : > { %1049 = vadd.xlane.f32.xlu0 %v1033_v58 }
 0x1ca   : > { %1055 = vadd.xlane.f32.xlu1 %v1036_v59 }
 0x1cc   : > { %1053 = vadd.xlane.f32.xlu0 %v1035_v60 }
 0x1ce   : > { %1059 = vadd.xlane.f32.xlu1 %v1038_v63 }
 0x1d0   : > { %1057 = vadd.xlane.f32.xlu0 %v1037_v0 }
 0x1d2   : > { %1063 = vadd.xlane.f32.xlu1 %v1040_v3 }
 0x1d4   : > { %1061 = vadd.xlane.f32.xlu0 %v1039_v4 }
 0x1d6   : > { %1067 = vadd.xlane.f32.xlu1 %v1042_v7 }
 0x1d8   : > { %1065 = vadd.xlane.f32.xlu0 %v1041_v8 }
 0x1da   : > { %1071 = vadd.xlane.f32.xlu1 %v1044_v11 }
 0x1dc   : > { %1069 = vadd.xlane.f32.xlu0 %v1043_v12 }
 0x1de   : > { %1075 = vadd.xlane.f32.xlu1 %v1046_v15 }
 0x1e0   : > { %1073 = vadd.xlane.f32.xlu0 %v1045_v16 }
 0x1e2   : > { %1079 = vadd.xlane.f32.xlu1 %v1048_v19 }
 0x1e4   : > { %1077 = vadd.xlane.f32.xlu0 %v1047_v20 }
 0x1e6   : > { %963 = vadd.xlane.f32.xlu1 %v942_v21 }
 0x1e8   : > { %961 = vadd.xlane.f32.xlu0 %v941_v22 }
 0x1ea   : > { %967 = vadd.xlane.f32.xlu1 %v944_v23 }
 0x1ec   : > { %965 = vadd.xlane.f32.xlu0 %v943_v24 }
 0x1ee   : > { %971 = vadd.xlane.f32.xlu1 %v946_v25 }
 0x1f0   : > { %969 = vadd.xlane.f32.xlu0 %v945_v26 }
 0x1f2   : > { %975 = vadd.xlane.f32.xlu1 %v948_v27 }
 0x1f4   : > { %973 = vadd.xlane.f32.xlu0 %v947_v28 }
 0x1f6   : > { %979 = vadd.xlane.f32.xlu1 %v950_v29 }
 0x1f8   : > { %977 = vadd.xlane.f32.xlu0 %v949_v30 }
 0x1fa   : > { %983 = vadd.xlane.f32.xlu1 %v952_v31 }
 0x1fc   : > { %981 = vadd.xlane.f32.xlu0 %v951_v32 }
 0x22a   : > { %v2203_v33 = vpop.xlane.xlu1 %957 }
 0x22d   : > { %v954_v34 = vpop.xlane.xlu0 %953 }
 0x22f   : > { %v960_v35 = vpop.xlane.xlu1 %959 }
 0x231   : > { %v956_v36 = vpop.xlane.xlu0 %955 }
 0x233   : > { %v1004_v37 = vpop.xlane.xlu1 %1003 }
 0x234   : > { %v1082_v54 = vmax.f32 %v1004_v37, 1e-16 }
 0x235   : > { %v1002_v38 = vpop.xlane.xlu0 %1001 }
 0x236   : > { %v1081_v57 = vmax.f32 %v1002_v38, 1e-16 }
 0x237   : > { %v1008_v39 = vpop.xlane.xlu1 %1007 }
 0x238   : > { %v1084_v62 = vmax.f32 %v1008_v39, 1e-16 }
 0x239   : > { %v1006_v40 = vpop.xlane.xlu0 %1005 }
 0x23a   : > { %v1083_v1 = vmax.f32 %v1006_v40, 1e-16 }
 0x23b   : > { %v1012_v41 = vpop.xlane.xlu1 %1011 }
 0x23c   : > { %v1086_v13 = vmax.f32 %v1012_v41, 1e-16 }
 0x23d   : > { %v1010_v42 = vpop.xlane.xlu0 %1009 }
 0x23e   : > { %v1085_v16 = vmax.f32 %v1010_v42, 1e-16 }
 0x23f   : > { %v1016_v43 = vpop.xlane.xlu1 %1015 }
 0x240   : > { %v1088_v25 = vmax.f32 %v1016_v43, 1e-16 }
 0x241   : > { %v2205_v44 = vpop.xlane.xlu0 %1013 }
 0x242   : > { %v1087_v28 = vmax.f32 %v2205_v44, 1e-16 }
 0x243   : > { %v2207_v45 = vpop.xlane.xlu1 %1019 }
 0x244   : > { %v1090_v37 = vmax.f32 %v2207_v45, 1e-16 }
 0x245   : > { %v2209_v46 = vpop.xlane.xlu0 %1017 }
 0x246   : > { %v1089_v39 = vmax.f32 %v2209_v46, 1e-16 }
 0x247   : > { %v2211_v47 = vpop.xlane.xlu1 %1023 }
 0x248   : > { %v1092_v43 = vmax.f32 %v2211_v47, 1e-16 }
 0x249   : > { %v2213_v48 = vpop.xlane.xlu0 %1021 }
 0x24b   : > { %v2215_v49 = vpop.xlane.xlu1 %1027 }
 0x24d   : > { %v2217_v50 = vpop.xlane.xlu0 %1025 }
 0x24f   : > { %v2219_v51 = vpop.xlane.xlu1 %1031 }
 0x251   : > { %v2221_v52 = vpop.xlane.xlu0 %1029 }
 0x253   : > { %v1052_v53 = vpop.xlane.xlu1 %1051 }
 0x254   : > { %v1098_v55 = vmax.f32 %v1052_v53, 1e-16  ;;  %v1091_v53 = vmax.f32 %v2213_v48, 1e-16 }
 0x255   : > { %v1050_v56 = vpop.xlane.xlu0 %1049 }
 0x256   : > { %v1097_v58 = vmax.f32 %v1050_v56, 1e-16  ;;  %v1114_v59 = vmul.f32 %v1098_v55, %v1082_v54 }
 0x257   : > { %v1056_v61 = vpop.xlane.xlu1 %1055 }
 0x258   : > { %v1113_v60 = vmul.f32 %v1097_v58, %v1081_v57  ;;  %1644 = vrsqrt.f32 %v1114_v59  ;;  %v1100_v63 = vmax.f32 %v1056_v61, 1e-16  ;;  %v1094_v58 = vmax.f32 %v2215_v49, 1e-16 }
 0x259   : > { %v1054_v0 = vpop.xlane.xlu0 %1053  ;;  %v1093_v61 = vmax.f32 %v2217_v50, 1e-16 }
 0x25a   : > { %1646 = vrsqrt.f32 %v1113_v60  ;;  %v1099_v2 = vmax.f32 %v1054_v0, 1e-16  ;;  %v1116_v3 = vmul.f32 %v1100_v63, %v1084_v62 }
 0x25b   : > { %v1060_v5 = vpop.xlane.xlu1 %1059 }
 0x25c   : > { %v1115_v4 = vmul.f32 %v1099_v2, %v1083_v1  ;;  %1648 = vrsqrt.f32 %v1116_v3  ;;  %v1102_v9 = vmax.f32 %v1060_v5, 1e-16 }
 0x25d   : > { %v1058_v6 = vpop.xlane.xlu0 %1057 }
 0x25e   : > { %1650 = vrsqrt.f32 %v1115_v4  ;;  %v1101_v11 = vmax.f32 %v1058_v6, 1e-16  ;;  %v1118_v19 = vmul.f32 %v1102_v9, %v1086_v13  ;;  %v1096_v4 = vmax.f32 %v2219_v51, 1e-16 }
 0x25f   : > { %v1064_v7 = vpop.xlane.xlu1 %1063  ;;  %v1095_v6 = vmax.f32 %v2221_v52, 1e-16 }
 0x260   : > { %v1104_v20 = vmax.f32 %v1064_v7, 1e-16  ;;  %v1117_v22 = vmul.f32 %v1101_v11, %v1085_v16  ;;  %1652 = vrsqrt.f32 %v1118_v19 }
 0x261   : > { %v1062_v8 = vpop.xlane.xlu0 %1061 }
 0x262   : > { %v1645_v10 = vpop.eup %1644  ;;  %v1103_v23 = vmax.f32 %v1062_v8, 1e-16  ;;  %v1120_v31 = vmul.f32 %v1104_v20, %v1088_v25  ;;  %1654 = vrsqrt.f32 %v1117_v22 }
 0x263   : > { %v1146_v14 = vmul.f32 %v1645_v10, %v956_v36  ;;  %v1068_v15 = vpop.xlane.xlu1 %1067 }
 0x264   : > { %v1647_v12 = vpop.eup %1646  ;;  %v1106_v32 = vmax.f32 %v1068_v15, 1e-16  ;;  %1656 = vrsqrt.f32 %v1120_v31 }
 0x265   : > { %v1145_v17 = vmul.f32 %v1647_v12, %v954_v34  ;;  %v1066_v18 = vpop.xlane.xlu0 %1065  ;;  %1162 = vst [vmem:[#allocation9 + $0x8] sm:$0xff] %v1146_v14  ;;  %v1119_v34 = vmul.f32 %v1103_v23, %v1087_v28 }
 0x266   : > { %v1649_v21 = vpop.eup %1648  ;;  %v1105_v36 = vmax.f32 %v1066_v18, 1e-16  ;;  %v1122_v40 = vmul.f32 %v1106_v32, %v1090_v37 }
 0x267   : > { %1161 = vst [vmem:[#allocation9] sm:$0xff] %v1145_v17  ;;  %v1148_v26 = vmul.f32 %v1649_v21, %v960_v35  ;;  %v1072_v27 = vpop.xlane.xlu1 %1071  ;;  %1658 = vrsqrt.f32 %v1119_v34 }
 0x268   : > { %v1651_v24 = vpop.eup %1650  ;;  %v1108_v41 = vmax.f32 %v1072_v27, 1e-16  ;;  %1660 = vrsqrt.f32 %v1122_v40 }
 0x269   : > { %v1147_v29 = vmul.f32 %v1651_v24, %v2203_v33  ;;  %v1070_v30 = vpop.xlane.xlu0 %1069  ;;  %1164 = vst [vmem:[#allocation9 + $0x18] sm:$0xff] %v1148_v26  ;;  %v1121_v33 = vmul.f32 %v1105_v36, %v1089_v39 }
 0x26a   : > { %v1107_v42 = vmax.f32 %v1070_v30, 1e-16  ;;  %v1124_v55 = vmul.f32 %v1108_v41, %v1092_v43  ;;  %v1653_v46 = vpop.eup %1652 }
 0x26b   : > { %1163 = vst [vmem:[#allocation9 + $0x10] sm:$0xff] %v1147_v29  ;;  %v1076_v38 = vpop.xlane.xlu1 %1075  ;;  %1662 = vrsqrt.f32 %v1121_v33 }
 0x26c   : > { %v1110_v56 = vmax.f32 %v1076_v38, 1e-16  ;;  %v1123_v45 = vmul.f32 %v1107_v42, %v1091_v53  ;;  %v1655_v60 = vpop.eup %1654  ;;  %1664 = vrsqrt.f32 %v1124_v55 }
 0x26d   : > { %v1074_v35 = vpop.xlane.xlu0 %1073 }
 0x26e   : > { %v1109_v57 = vmax.f32 %v1074_v35, 1e-16  ;;  %v1126_v47 = vmul.f32 %v1110_v56, %v1094_v58  ;;  %1666 = vrsqrt.f32 %v1123_v45  ;;  %v1657_v3 = vpop.eup %1656 }
 0x26f   : > { %v1080_v44 = vpop.xlane.xlu1 %1079 }
 0x270   : > { %v1112_v0 = vmax.f32 %v1080_v44, 1e-16  ;;  %v1125_v1 = vmul.f32 %v1109_v57, %v1093_v61  ;;  %1668 = vrsqrt.f32 %v1126_v47 }
 0x271   : > { %v1078_v54 = vpop.xlane.xlu0 %1077  ;;  %v1659_v49 = vpop.eup %1658 }
 0x272   : > { %v1111_v2 = vmax.f32 %v1078_v54, 1e-16  ;;  %v1128_v8 = vmul.f32 %v1112_v0, %v1096_v4  ;;  %1670 = vrsqrt.f32 %v1125_v1  ;;  %v1661_v11 = vpop.eup %1660 }
 0x273   : > { %v964_v59 = vpop.xlane.xlu1 %963 }
 0x274   : > { %v1150_v62 = vmul.f32 %v1653_v46, %v964_v59  ;;  %v1127_v10 = vmul.f32 %v1111_v2, %v1095_v6  ;;  %1672 = vrsqrt.f32 %v1128_v8 }
 0x275   : > { %v962_v63 = vpop.xlane.xlu0 %961  ;;  %v1663_v13 = vpop.eup %1662 }
 0x276   : > { %v1149_v48 = vmul.f32 %v1655_v60, %v962_v63  ;;  %1166 = vst [vmem:[#allocation9 + $0x28] sm:$0xff] %v1150_v62  ;;  %1674 = vrsqrt.f32 %v1127_v10  ;;  %v1665_v16 = vpop.eup %1664 }
 0x277   : > { %v968_v5 = vpop.xlane.xlu1 %967 }
 0x278   : > { %1165 = vst [vmem:[#allocation9 + $0x20] sm:$0xff] %v1149_v48  ;;  %v1152_v7 = vmul.f32 %v1657_v3, %v968_v5  ;;  %v1667_v17 = vpop.eup %1666 }
 0x279   : > { %v966_v50 = vpop.xlane.xlu0 %965 }
 0x27a   : > { %v1151_v9 = vmul.f32 %v1659_v49, %v966_v50  ;;  %1168 = vst [vmem:[#allocation9 + $0x38] sm:$0xff] %v1152_v7  ;;  %v1669_v21 = vpop.eup %1668 }
 0x27b   : > { %v972_v12 = vpop.xlane.xlu1 %971 }
 0x27c   : > { %1167 = vst [vmem:[#allocation9 + $0x30] sm:$0xff] %v1151_v9  ;;  %v1154_v14 = vmul.f32 %v1661_v11, %v972_v12  ;;  %v1671_v23 = vpop.eup %1670 }
 0x27d   : > { %v970_v15 = vpop.xlane.xlu0 %969 }
 0x27e   : > { %v1153_v51 = vmul.f32 %v1663_v13, %v970_v15  ;;  %1170 = vst [vmem:[#allocation9 + $0x48] sm:$0xff] %v1154_v14  ;;  %v1673_v27 = vpop.eup %1672 }
 0x27f   : > { %v976_v52 = vpop.xlane.xlu1 %975 }
 0x280   : > { %1169 = vst [vmem:[#allocation9 + $0x40] sm:$0xff] %v1153_v51  ;;  %v1156_v18 = vmul.f32 %v1665_v16, %v976_v52  ;;  %v1675_v29 = vpop.eup %1674 }
 0x281   : > { %v974_v19 = vpop.xlane.xlu0 %973 }
 0x282   : > { %v1155_v20 = vmul.f32 %v1667_v17, %v974_v19  ;;  %1172 = vst [vmem:[#allocation9 + $0x58] sm:$0xff] %v1156_v18 }
 0x283   : > { %v980_v22 = vpop.xlane.xlu1 %979 }
 0x284   : > { %1171 = vst [vmem:[#allocation9 + $0x50] sm:$0xff] %v1155_v20  ;;  %v1158_v24 = vmul.f32 %v1669_v21, %v980_v22 }
 0x285   : > { %v978_v25 = vpop.xlane.xlu0 %977 }
 0x286   : > { %v1157_v26 = vmul.f32 %v1671_v23, %v978_v25  ;;  %1174 = vst [vmem:[#allocation9 + $0x68] sm:$0xff] %v1158_v24 }
 0x287   : > { %v984_v28 = vpop.xlane.xlu1 %983 }
 0x288   : > { %1173 = vst [vmem:[#allocation9 + $0x60] sm:$0xff] %v1157_v26  ;;  %v1160_v30 = vmul.f32 %v1673_v27, %v984_v28 }
 0x289   : > { %v982_v31 = vpop.xlane.xlu0 %981 }
 0x28a   : > { %v1159_v32 = vmul.f32 %v1675_v29, %v982_v31  ;;  %1176 = vst [vmem:[#allocation9 + $0x78] sm:$0xff] %v1160_v30 }
 0x28c   : > { %1175 = vst [vmem:[#allocation9 + $0x70] sm:$0xff] %v1159_v32 }
 0x28d PF: > { %p1521_p7 = scmp.eq.s32.totalorder %s1913_s18, 2  ;;  %s1861_s15 = smov [#allocation9]  }
 0x28e   : > { %s1186_s22 = sshll.u32 %s1861_s15, 4  ;;  %s1187_s22 = int_to_ptr.vmem [resolvable:$true] %s1186_s22 }
 0x28f   : > { %s1766_s24 = scalar_lea.vmem %s1187_s22, 2048  ;;  %p1773_p6 = scmp.lt.s32.totalorder %s1187_s22, %s1187_s22 }
 0x290   : > { %p1767_p10 = scmp.ne.s32.totalorder %s1187_s22, %s1766_s24  ;;  %p1774_p8 = scmp.lt.s32.totalorder %s1766_s24, %s1766_s24 }
 0x292   : > { %p1768_p1 = pnand %p1767_p10, %p1521_p7  ;;  %p1775_p11 = por %p1774_p8, %p1773_p6 }
 0x294   : > { %p1769_p4 = pneg %p1768_p1 }
 0x296   : > { %p1776_p5 = pnand %p1775_p11, %p1769_p4 }
 0x298   : > { %1779 = shalt.err (!%p1776_p5)
}
 0x299   : > { %s1780_s4 = scalar_lea.hbm %s2277_s3, 2048 }
 0x29a   : > { %p1781_p0 = scmp.ne.s32.totalorder %s2277_s3, %s1780_s4  ;;  %p1786_p12 = scmp.lt.u32.totalorder %s1780_s4, %s2277_s3 }
 0x29c   : > { %p1782_p2 = pnand %p1781_p0, %p1521_p7 }
 0x29e   : > { %p1783_p13 = pneg %p1782_p2 }
 0x2a0   : > { %p1788_p9 = pnand %p1786_p12, %p1783_p13 }
 0x2a2   : > { %1791 = shalt.err (!%p1788_p9)
}
 0x2a3   : > { %s1862_s21 = smov 128   ;;  %s1863_s29 = smov 8  }
 0x2a4   : > { %1507 = dma.vmem_to_hbm [thread:$0]  (%p1521_p7), %s1187_s22, 2048, %s2277_s3, [#allocation5], %s1862_s21, %s1862_s21, %s1863_s29  }
 0x2a5   : > { %1825 = dma.done.wait (%p1521_p7), [#allocation5], 2048  }
 0x2a6   : > { %1827 = vsyncadd (%p1521_p7), [#allocation5], 4294965248 }
 0x2a7 PF: > { %s20_s17 = sadd.s32 1, %s1850_s17   ;;  %s2291_s12 = smov %s1834_s13 }
 0x2a8   : > { %p17_p3 = scmp.ge.s32.totalorder %s20_s17, 5   ;;  %s2292_s13 = smov %s1838_s14 }
 0x2a9   : > { %s2293_s14 = smov %s1932_s23  ;;  %s2294_s15 = smov %s1846_s16 }
 0x2aa   : > { %s2295_s16 = smov %s2297_s19  ;;  %19 = sbr.rel (!%p17_p3) target bundleno = 7 (0x7), region = 102 }
 0x2b1   :  { %1202 = vsyncpa [#allocation4], 1 }
 0x2b2   :  { %1204 = vsyncpa [#allocation4 + $0x1], 1 }
 0x2b3   :  { %1205 = vsyncpa [#allocation7], 1 }
 0x2b4   :  { %1207 = vsyncpa [#allocation7 + $0x1], 1 }
 0x2b5   :  { %1208 = vsyncpa [#allocation5], 1 }
 0x2b6   :  { %1210 = vsyncpa [#allocation5 + $0x1], 1 }

</bundles_post_ra>
